<compile_context>
chip_gen: v6e
topology: v6e:2x2x1
jax: 0.10.0
libtpu: 0.0.40
codegen_flags: <defaults>
</compile_context>

<pallas_src>
import functools

import jax
import jax.numpy as jnp
from jax import lax
from jax.experimental import pallas as pl
from jax.experimental.pallas import tpu as pltpu


def neuralnet_kernel(x_ref, w1_ref, w2_ref, p_ref, o_ref, *, hp, cp):
    # In-kernel bf16 cast of x (VPU has massive slack; avoids a wrapper-side op).
    xb = x_ref[...].astype(jnp.bfloat16)

    # Packed per-feature parameter rows (one (8, lane) DMA instead of four):
    #   row 0: fc1 bias   row 1: gamma   row 2: beta   row 3: fc2 bias
    b1 = p_ref[0:1, 0:hp]
    gamma = p_ref[1:2, 0:hp]
    beta = p_ref[2:3, 0:hp]
    b2 = p_ref[3:4, 0:cp]

    # fc1 on the MXU: bf16 operands, f32 accumulate.
    h = jnp.dot(xb, w1_ref[...], preferred_element_type=jnp.float32) + b1

    # ReLU (VPU, f32).
    h = jnp.maximum(h, 0.0)

    # BatchNorm1d, training-mode batch stats (biased variance, eps=1e-5).
    # Single reduction pass (sum & sum-of-squares), gamma/beta folded into one
    # scale/shift FMA.
    inv_b = 1.0 / h.shape[0]
    mean = jnp.sum(h, axis=0, keepdims=True) * inv_b
    mean_sq = jnp.sum(h * h, axis=0, keepdims=True) * inv_b
    var = jnp.maximum(mean_sq - mean * mean, 0.0)  # guard f32 cancellation
    scale = gamma * lax.rsqrt(var + 1e-5)
    shift = beta - mean * scale
    h = h * scale + shift

    # Dropout -> identity (eval mode).
    # TODO(synk): stochastic dropout via pltpu.prng_seed + pltpu.stateful_bernoulli.

    # fc2 on the MXU.
    logits = jnp.dot(h.astype(jnp.bfloat16), w2_ref[...],
                     preferred_element_type=jnp.float32) + b2

    # Sigmoid: exp (EUP) + approx reciprocal (EUP); no VPU divide.
    o_ref[...] = pl.reciprocal(1.0 + jnp.exp(-logits), approx=True)


def make_neuralnet_forward(w1, b1, w2, b2, gamma, beta, *, lane=128):
    """Prepare (pad / transpose / cast) the parameters ONCE and return a jitted
    forward(x) -> (B, num_classes). All weight prep is hoisted out of the
    per-call path; only the pallas_call (+ a fused slice) runs per call."""
    H, I = w1.shape
    C = w2.shape[0]
    Hp = ((H + lane - 1) // lane) * lane
    Cp = ((C + lane - 1) // lane) * lane
    Lp = max(Hp, Cp)

    # Pre-transposed, zero-padded, bf16 MXU operands. Padded columns are
    # mathematically inert: zero weight/bias/gamma/beta -> padded hidden units
    # normalize to exactly 0 and contribute nothing to fc2.
    w1t = jnp.zeros((I, Hp), jnp.float32).at[:, :H].set(w1.T).astype(jnp.bfloat16)
    w2t = jnp.zeros((Hp, Cp), jnp.float32).at[:H, :C].set(w2.T).astype(jnp.bfloat16)

    # Pack the four per-feature vectors into one (8, Lp) f32 tile (one DMA
    # instead of four separately-padded (8,128) tiles).
    params = (jnp.zeros((8, Lp), jnp.float32)
              .at[0, :H].set(b1)
              .at[1, :H].set(gamma)
              .at[2, :H].set(beta)
              .at[3, :C].set(b2))

    # Materialize now so no prep work leaks into the per-call path.
    w1t, w2t, params = jax.block_until_ready((w1t, w2t, params))

    kernel = functools.partial(neuralnet_kernel, hp=Hp, cp=Cp)
    vmem = pl.BlockSpec(memory_space=pltpu.VMEM)

    @jax.jit
    def forward(x):
        B = x.shape[0]
        cost = pl.CostEstimate(
            flops=2 * B * I * Hp + 2 * B * Hp * Cp,
            transcendentals=2 * B * Cp,  # exp + reciprocal
            bytes_accessed=(x.size * 4 + w1t.size * 2 + w2t.size * 2
                            + params.size * 4 + B * Cp * 4),
        )
        out_padded = pl.pallas_call(
            kernel,
            out_shape=jax.ShapeDtypeStruct((B, Cp), jnp.float32),
            in_specs=[vmem] * 4,
            out_specs=vmem,
            cost_estimate=cost,
        )(x, w1t, w2t, params)
        # Slice inside the jit so it fuses with downstream consumers.
        # TODO(synk): expose the padded (B, Cp) slab directly if the next layer
        #             can consume the lane-dense padded layout.
        return out_padded[:, :C]

    return forward


if __name__ == "__main__":
    # Small, module-consistent shapes.
    batch = 8
    input_size = 32
    hidden_size = 64
    num_classes = 16
    dropout_rate = 0.5  # unused (eval-mode dropout)

    key = jax.random.PRNGKey(0)
    kx, kw1, kb1, kw2, kb2 = jax.random.split(key, 5)

    x = jax.random.normal(kx, (batch, input_size), dtype=jnp.float32)

    # Deterministic parameter init (PyTorch-like uniform bounds).
    lim1 = 1.0 / (input_size ** 0.5)
    w1 = jax.random.uniform(kw1, (hidden_size, input_size),
                            minval=-lim1, maxval=lim1, dtype=jnp.float32)
    b1 = jax.random.uniform(kb1, (hidden_size,),
                            minval=-lim1, maxval=lim1, dtype=jnp.float32)

    lim2 = 1.0 / (hidden_size ** 0.5)
    w2 = jax.random.uniform(kw2, (num_classes, hidden_size),
                            minval=-lim2, maxval=lim2, dtype=jnp.float32)
    b2 = jax.random.uniform(kb2, (num_classes,),
                            minval=-lim2, maxval=lim2, dtype=jnp.float32)

    # BatchNorm affine params (PyTorch default init: gamma=1, beta=0).
    gamma = jnp.ones((hidden_size,), dtype=jnp.float32)
    beta = jnp.zeros((hidden_size,), dtype=jnp.float32)

    # Parameter prep happens once here; `forward` is the hot per-call path.
    forward = make_neuralnet_forward(w1, b1, w2, b2, gamma, beta)

    out = forward(x)
    jax.block_until_ready(out)
    assert out.shape == (batch, num_classes)

    # Cross-check against a pure-JAX reference of the same math
    # (same bf16-operand / f32-accumulate matmuls, f32 elementwise).
    h_ref = jnp.dot(x.astype(jnp.bfloat16), w1.T.astype(jnp.bfloat16),
                    preferred_element_type=jnp.float32) + b1
    h_ref = jnp.maximum(h_ref, 0.0)
    m = h_ref.mean(0, keepdims=True)
    v = (h_ref * h_ref).mean(0, keepdims=True) - m * m
    h_ref = (h_ref - m) * lax.rsqrt(v + 1e-5) * gamma + beta
    logits_ref = jnp.dot(h_ref.astype(jnp.bfloat16), w2.T.astype(jnp.bfloat16),
                         preferred_element_type=jnp.float32) + b2
    ref = jax.nn.sigmoid(logits_ref)
    assert jnp.allclose(out, ref, atol=5e-3, rtol=5e-3), "mismatch vs reference"

    print("KERNEL_OK")
</pallas_src>

<mosaic_0001>
module attributes {stable_mosaic.version = 11 : i64} {
  func.func @neuralnet_kernel(%arg0: memref<8x32xf32, #tpu.memory_space<vmem>>, %arg1: memref<32x128xbf16, #tpu.memory_space<vmem>>, %arg2: memref<128x128xbf16, #tpu.memory_space<vmem>>, %arg3: memref<8x128xf32, #tpu.memory_space<vmem>>, %arg4: memref<8x128xf32, #tpu.memory_space<vmem>>) attributes {dimension_semantics = [], scalar_prefetch = 0 : i64, scratch_operands = 0 : i64, tpu.core_type = #tpu.core_type<tc>} {
    %c0 = arith.constant 0 : index
    %c0_0 = arith.constant 0 : index
    %0 = vector.load %arg0[%c0, %c0_0] : memref<8x32xf32, #tpu.memory_space<vmem>>, vector<8x32xf32>
    %1 = arith.truncf %0 : vector<8x32xf32> to vector<8x32xbf16>
    %c0_1 = arith.constant 0 : index
    %c0_2 = arith.constant 0 : index
    %2 = vector.load %arg3[%c0_1, %c0_2] : memref<8x128xf32, #tpu.memory_space<vmem>>, vector<1x128xf32>
    %c1 = arith.constant 1 : index
    %c0_3 = arith.constant 0 : index
    %3 = vector.load %arg3[%c1, %c0_3] : memref<8x128xf32, #tpu.memory_space<vmem>>, vector<1x128xf32>
    %c2 = arith.constant 2 : index
    %c0_4 = arith.constant 0 : index
    %4 = vector.load %arg3[%c2, %c0_4] : memref<8x128xf32, #tpu.memory_space<vmem>>, vector<1x128xf32>
    %c3 = arith.constant 3 : index
    %c0_5 = arith.constant 0 : index
    %5 = vector.load %arg3[%c3, %c0_5] : memref<8x128xf32, #tpu.memory_space<vmem>>, vector<1x128xf32>
    %c0_6 = arith.constant 0 : index
    %c0_7 = arith.constant 0 : index
    %6 = vector.load %arg1[%c0_6, %c0_7] : memref<32x128xbf16, #tpu.memory_space<vmem>>, vector<32x128xbf16>
    %cst = arith.constant dense<0.000000e+00> : vector<8x128xf32>
    %7 = tpu.matmul %1, %6, %cst {dimension_numbers = #tpu.dot_dimension_numbers<[1], [0], [0], [1], [0, 0, 1, 1], [], []>} : vector<8x32xbf16>, vector<32x128xbf16>, vector<8x128xf32> -> vector<8x128xf32>
    %8 = vector.broadcast %2 : vector<1x128xf32> to vector<8x128xf32>
    %9 = arith.addf %7, %8 : vector<8x128xf32>
    %cst_8 = arith.constant 0.000000e+00 : f32
    %10 = vector.broadcast %cst_8 : f32 to vector<8x128xf32>
    %11 = arith.maximumf %9, %10 : vector<8x128xf32>
    %cst_9 = arith.constant dense<0.000000e+00> : vector<128xf32>
    %12 = vector.multi_reduction <add>, %11, %cst_9 [0] : vector<8x128xf32> to vector<128xf32>
    %13 = vector.shape_cast %12 : vector<128xf32> to vector<1x128xf32>
    %cst_10 = arith.constant 1.250000e-01 : f32
    %14 = vector.broadcast %cst_10 : f32 to vector<1x128xf32>
    %15 = arith.mulf %13, %14 : vector<1x128xf32>
    %16 = arith.mulf %11, %11 : vector<8x128xf32>
    %cst_11 = arith.constant dense<0.000000e+00> : vector<128xf32>
    %17 = vector.multi_reduction <add>, %16, %cst_11 [0] : vector<8x128xf32> to vector<128xf32>
    %18 = vector.shape_cast %17 : vector<128xf32> to vector<1x128xf32>
    %cst_12 = arith.constant 1.250000e-01 : f32
    %19 = vector.broadcast %cst_12 : f32 to vector<1x128xf32>
    %20 = arith.mulf %18, %19 : vector<1x128xf32>
    %21 = arith.mulf %15, %15 : vector<1x128xf32>
    %22 = arith.subf %20, %21 : vector<1x128xf32>
    %cst_13 = arith.constant 0.000000e+00 : f32
    %23 = vector.broadcast %cst_13 : f32 to vector<1x128xf32>
    %24 = arith.maximumf %22, %23 : vector<1x128xf32>
    %cst_14 = arith.constant 9.99999974E-6 : f32
    %25 = vector.broadcast %cst_14 : f32 to vector<1x128xf32>
    %26 = arith.addf %24, %25 : vector<1x128xf32>
    %27 = math.rsqrt %26 : vector<1x128xf32>
    %28 = arith.mulf %3, %27 : vector<1x128xf32>
    %29 = arith.mulf %15, %28 : vector<1x128xf32>
    %30 = arith.subf %4, %29 : vector<1x128xf32>
    %31 = vector.broadcast %28 : vector<1x128xf32> to vector<8x128xf32>
    %32 = arith.mulf %11, %31 : vector<8x128xf32>
    %33 = vector.broadcast %30 : vector<1x128xf32> to vector<8x128xf32>
    %34 = arith.addf %32, %33 : vector<8x128xf32>
    %35 = arith.truncf %34 : vector<8x128xf32> to vector<8x128xbf16>
    %c0_15 = arith.constant 0 : index
    %c0_16 = arith.constant 0 : index
    %36 = vector.load %arg2[%c0_15, %c0_16] : memref<128x128xbf16, #tpu.memory_space<vmem>>, vector<128x128xbf16>
    %cst_17 = arith.constant dense<0.000000e+00> : vector<8x128xf32>
    %37 = tpu.matmul %35, %36, %cst_17 {dimension_numbers = #tpu.dot_dimension_numbers<[1], [0], [0], [1], [0, 0, 1, 1], [], []>} : vector<8x128xbf16>, vector<128x128xbf16>, vector<8x128xf32> -> vector<8x128xf32>
    %38 = vector.broadcast %5 : vector<1x128xf32> to vector<8x128xf32>
    %39 = arith.addf %37, %38 : vector<8x128xf32>
    %cst_18 = arith.constant 0.000000e+00 : f32
    %40 = vector.broadcast %cst_18 : f32 to vector<8x128xf32>
    %41 = arith.subf %40, %39 : vector<8x128xf32>
    %42 = math.exp %41 : vector<8x128xf32>
    %cst_19 = arith.constant 1.000000e+00 : f32
    %43 = vector.broadcast %cst_19 : f32 to vector<8x128xf32>
    %44 = arith.addf %43, %42 : vector<8x128xf32>
    %45 = tpu.reciprocal %44 {approx = true} : vector<8x128xf32> -> vector<8x128xf32>
    %c0_20 = arith.constant 0 : index
    %c0_21 = arith.constant 0 : index
    %46 = vector.load %arg4[%c0_20, %c0_21] : memref<8x128xf32, #tpu.memory_space<vmem>>, vector<8x128xf32>
    tpu.vector_store %arg4[%c0_20, %c0_21], %45 {strides = array<i32>} : memref<8x128xf32, #tpu.memory_space<vmem>>, vector<8x128xf32>,
    return
  }
}

</mosaic_0001>

<bundles_post_ra>
// kernel: forward.1
= control target key start
LH: loop header
LB: loop body
LE: loop exit
PB: predicated region body
PF: predicated region fallthrough
CT: control target
= control target key end

     0   :  { %9 = vsyncpa [#allocation3], 0  ;;  %s541_s0 = inlined_call_operand.hbm [shape: f32[8,32], index: 0, kind: input, shape index: {}]   ;;  %s542_s1 = inlined_call_operand.hbm [shape: bf16[32,128], index: 1, kind: input, shape index: {}]   ;;  %s543_s2 = inlined_call_operand.hbm [shape: bf16[128,128], index: 2, kind: input, shape index: {}]   ;;  %s544_s3 = inlined_call_operand.hbm [shape: f32[8,128], index: 3, kind: input, shape index: {}]   ;;  %s545_s4 = inlined_call_operand.hbm [shape: f32[8,128], index: 4, kind: output, shape index: {}]  }
   0x1   :  { %10 = vsyncpa [#allocation6], 0 }
   0x2   :  { %11 = vsyncpa [#allocation9], 0 }
   0x3   :  { %12 = vsyncpa [#allocation4], 0  ;;  %s492_s15 = smov [#allocation5]  }
   0x4   :  { %s28_s16 = sshll.u32 %s492_s15, 4  ;;  %s29_s16 = int_to_ptr.vmem [resolvable:$true] %s28_s16 }
   0x5   :  { %s392_s17 = scalar_lea.vmem %s29_s16, 256  ;;  %p397_p1 = scmp.lt.s32.totalorder %s29_s16, %s29_s16 }
   0x6   :  { %p393_p0 = scmp.ne.s32.totalorder %s29_s16, %s392_s17  ;;  %p398_p2 = scmp.lt.s32.totalorder %s392_s17, %s392_s17 }
   0x8   :  { %p399_p3 = por %p398_p2, %p397_p1 }
   0xa   :  { %p400_p4 = pnand %p399_p3, %p393_p0 }
   0xc   :  { %403 = shalt.err (!%p400_p4)
}
   0xd   :  { %s493_s18 = smov 64   ;;  %s494_s19 = smov 4  }
   0xe   :  { %34 = dma.hbm_to_vmem [thread:$0]  %s542_s1, 256, %s29_s16, [#allocation6], %s493_s18, %s493_s18, %s494_s19  }
   0xf   :  { %s495_s22 = smov [#allocation2]   ;;  %s496_s24 = smov [#allocation7]  }
  0x10   :  { %s19_s23 = sshll.u32 %s495_s22, 4  ;;  %s40_s25 = sshll.u32 %s496_s24, 4  ;;  %s20_s23 = int_to_ptr.vmem [resolvable:$true] %s19_s23  ;;  %s41_s25 = int_to_ptr.vmem [resolvable:$true] %s40_s25 }
  0x11   :  { %s412_s26 = scalar_lea.vmem %s20_s23, 128  ;;  %p417_p6 = scmp.lt.s32.totalorder %s20_s23, %s20_s23 }
  0x12   :  { %p413_p5 = scmp.ne.s32.totalorder %s20_s23, %s412_s26  ;;  %p418_p7 = scmp.lt.s32.totalorder %s412_s26, %s412_s26 }
  0x14   :  { %p419_p8 = por %p418_p7, %p417_p6 }
  0x16   :  { %p420_p9 = pnand %p419_p8, %p413_p5 }
  0x18   :  { %423 = shalt.err (!%p420_p9)
}
  0x19   :  { %22 = dma.hbm_to_vmem [thread:$0]  %s541_s0, 128, %s20_s23, [#allocation3]  }
  0x1a   :  { %s432_s29 = scalar_lea.vmem %s41_s25, 1024  ;;  %p437_p11 = scmp.lt.s32.totalorder %s41_s25, %s41_s25 }
  0x1b   :  { %p433_p10 = scmp.ne.s32.totalorder %s41_s25, %s432_s29  ;;  %p438_p12 = scmp.lt.s32.totalorder %s432_s29, %s432_s29 }
  0x1d   :  { %p439_p13 = por %p438_p12, %p437_p11 }
  0x1f   :  { %p440_p0 = pnand %p439_p13, %p433_p10 }
  0x21   :  { %443 = shalt.err (!%p440_p0)
}
  0x22   :  { %46 = dma.hbm_to_vmem [thread:$0]  %s543_s2, 1024, %s41_s25, [#allocation6], %s493_s18, %s493_s18, %s494_s19  }
  0x23   :  { %s497_s5 = smov [#allocation8]  }
  0x24   :  { %s53_s6 = sshll.u32 %s497_s5, 4  ;;  %s54_s6 = int_to_ptr.vmem [resolvable:$true] %s53_s6 }
  0x25   :  { %s452_s7 = scalar_lea.vmem %s54_s6, 128  ;;  %p457_p2 = scmp.lt.s32.totalorder %s54_s6, %s54_s6 }
  0x26   :  { %p453_p1 = scmp.ne.s32.totalorder %s54_s6, %s452_s7  ;;  %p458_p3 = scmp.lt.s32.totalorder %s452_s7, %s452_s7 }
  0x28   :  { %p459_p4 = por %p458_p3, %p457_p2 }
  0x2a   :  { %p460_p5 = pnand %p459_p4, %p453_p1 }
  0x2c   :  { %463 = shalt.err (!%p460_p5)
}
  0x2d   :  { %56 = dma.hbm_to_vmem [thread:$0]  %s544_s3, 128, %s54_s6, [#allocation9]  }
  0x2e   :  { %484 = dma.done.wait [#allocation3], 128  }
  0x2f   :  { %485 = vsyncadd [#allocation3], 4294967168 }
  0x30   :  { %486 = dma.done.wait [#allocation6], 1280  }
  0x31   :  { %487 = vsyncadd [#allocation6], 4294966016 }
  0x32   :  { %488 = dma.done.wait [#allocation9], 128  }
  0x33   :  { %489 = vsyncadd [#allocation9], 4294967168  ;;  %v498_v0 = vmov 0.0   ;;  %vm499_vm0 = vmmov 0   ;;  %v368_v1 = vld [vmem:[#allocation5 + $0x8] sm:$0xff]   ;;  %v369_v2 = vld [vmem:[#allocation5] sm:$0xff]   ;;  %v164_v39 = vlaneseq }
  0x34   :  { %331 = vmatprep.subr.bf16.mxu0 %v498_v0  ;;  %335 = vmatprep.mubr.msk.bf16.mxu0 %vm499_vm0, %v498_v0  ;;  %v70_v3 = vld [vmem:[#allocation2] sm:$0xff]  ;;  %vm96_vm1 = vcmask 261120   ;;  %v370_v5 = vld [vmem:[#allocation7 + $0x38] sm:$0xff]   ;;  %v371_v6 = vld [vmem:[#allocation7 + $0x30] sm:$0xff]   ;;  %s500_s2 = smov [#allocation10]  }
  0x35   :  { %339 = vmatprep.subr.bf16.mxu1 %v498_v0  ;;  %355 = vmatprep.mubr.msk.bf16.mxu1 %vm499_vm0, %v498_v0  ;;  %v71_v4 = vpack.c.bf16 %v70_v3, %v70_v3  ;;  %v372_v7 = vld [vmem:[#allocation7 + $0x28] sm:$0xff]   ;;  %v373_v8 = vld [vmem:[#allocation7 + $0x20] sm:$0xff]   ;;  %v374_v9 = vld [vmem:[#allocation7 + $0x18] sm:$0xff]   ;;  %v165_v40 = vshrl.u32 %v164_v39, 7  ;;  %s295_s3 = sshll.u32 %s500_s2, 4  ;;  %s296_s3 = int_to_ptr.vmem [resolvable:$true] %s295_s3 }
  0x36   :  { %332 = vmatpush3.bf16.msra.mxu0 %v368_v1  ;;  %340 = vmatpush3.bf16.msra.mxu1 %v370_v5  ;;  %v375_v10 = vld [vmem:[#allocation7 + $0x10] sm:$0xff]   ;;  %v376_v11 = vld [vmem:[#allocation7 + $0x8] sm:$0xff]   ;;  %v377_v12 = vld [vmem:[#allocation7] sm:$0xff]   ;;  %s464_s9 = scalar_lea.vmem %s296_s3, 128  ;;  %p469_p7 = scmp.lt.s32.totalorder %s296_s3, %s296_s3 }
  0x37   :  { %333 = vmatprep.subr.bf16.mxu0 %v498_v0  ;;  %341 = vmatprep.subr.bf16.mxu1 %v498_v0  ;;  %v306_v13 = vld [vmem:[#allocation8] ss:$0 sm:$0xff]  ;;  %v73_v41 = vld [vmem:[#allocation8 + $0x1] sm:$0x1]  ;;  %v166_v42 = vsub.s32 0, %v165_v40  ;;  %p465_p6 = scmp.ne.s32.totalorder %s296_s3, %s464_s9  ;;  %p470_p8 = scmp.lt.s32.totalorder %s464_s9, %s464_s9 }
  0x38   :  { %v74_v45 = vld [vmem:[#allocation8 + $0x2] sm:$0x1]  ;;  %v310_v53 = vld [vmem:[#allocation8 + $0x3] ss:$0 sm:$0xff] }
  0x39   :  { %p471_p9 = por %p470_p8, %p469_p7 }
  0x3a   :  { %334 = vmatpush3.bf16.msra.mxu0 %v369_v2  ;;  %342 = vmatpush3.bf16.msra.mxu1 %v371_v6 }
  0x3b   :  { %343 = vmatprep.subr.bf16.mxu1 %v498_v0  ;;  %p472_p10 = pnand %p471_p9, %p465_p6 }
  0x3d   :  { %336 = vmatmul.mubr.msk.bf16.vlgmr.msra.gmra.mxu0 %vm96_vm1, %v71_v4 }
  0x3e   :  { %344 = vmatpush3.bf16.msra.mxu1 %v372_v7 }
  0x3f   :  { %345 = vmatprep.subr.bf16.mxu1 %v498_v0 }
  0x42   :  { %346 = vmatpush3.bf16.msra.mxu1 %v373_v8 }
  0x43   :  { %347 = vmatprep.subr.bf16.mxu1 %v498_v0 }
  0x46   :  { %348 = vmatpush3.bf16.msra.mxu1 %v374_v9 }
  0x47   :  { %349 = vmatprep.subr.bf16.mxu1 %v498_v0 }
  0x4a   :  { %350 = vmatpush3.bf16.msra.mxu1 %v375_v10 }
  0x4b   :  { %351 = vmatprep.subr.bf16.mxu1 %v498_v0 }
  0x4e   :  { %352 = vmatpush3.bf16.msra.mxu1 %v376_v11 }
  0x4f   :  { %353 = vmatprep.subr.bf16.mxu1 %v498_v0 }
  0x52   :  { %354 = vmatpush3.bf16.msra.mxu1 %v377_v12 }
  0xfd   :  { %v134_v14 = vpop.f32.mrf.mxu0 }
  0xfe   :  { %v135_v15 = vadd.f32 %v306_v13, %v134_v14 }
  0xff   :  { %v337_v16 = vpop.f32.mrf.mxu0 }
 0x100   :  { %v140_v17 = vmax.f32 %v135_v15, 0.0 }
 0x101   :  { %v137_v18 = vpop.f32.mrf.mxu0 }
 0x102   :  { %v141_v19 = vrot.slane %v140_v17, 4  ;;  %v148_v20 = vmul.f32 %v140_v17, %v140_v17 }
 0x103   :  { %v338_v21 = vpop.f32.mrf.mxu0 }
 0x104   :  { %v142_v22 = vadd.f32 %v141_v19, %v140_v17  ;;  %v149_v23 = vrot.slane %v148_v20, 4 }
 0x106   :  { %v143_v24 = vrot.slane %v142_v22, 2  ;;  %v150_v25 = vadd.f32 %v149_v23, %v148_v20 }
 0x108   :  { %v144_v26 = vadd.f32 %v143_v24, %v142_v22  ;;  %v151_v27 = vrot.slane %v150_v25, 2 }
 0x10a   :  { %v145_v28 = vrot.slane %v144_v26, 1  ;;  %v152_v29 = vadd.f32 %v151_v27, %v150_v25 }
 0x10c   :  { %v153_v30 = vrot.slane %v152_v29, 1  ;;  %v146_v31 = vadd.f32 %v145_v28, %v144_v26 }
 0x10e   :  { %v154_v32 = vadd.f32 %v153_v30, %v152_v29  ;;  %v147_v33 = vmul.f32 0.125, %v146_v31 }
 0x110   :  { %v155_v34 = vmul.f32 0.125, %v154_v32  ;;  %v156_v35 = vmul.f32 %v147_v33, %v147_v33 }
 0x112   :  { %v157_v36 = vsub.f32 %v155_v34, %v156_v35 }
 0x114   :  { %v158_v37 = vmax.f32 %v157_v36, 0.0 }
 0x116   :  { %v159_v38 = vadd.f32 1e-05, %v158_v37 }
 0x118   :  { %378 = vrsqrt.f32 %v159_v38 }
 0x125   :  { %v379_v43 = vpop.eup %378 }
 0x126   :  { %v161_v44 = vmul.f32 %v379_v43, %v73_v41 }
 0x128   :  { %v162_v46 = vmul.f32 %v161_v44, %v147_v33  ;;  %v167_v47 = vrot.slane %v161_v44, %v166_v42 }
 0x12a   :  { %v163_v48 = vsub.f32 %v74_v45, %v162_v46  ;;  %v168_v49 = vmul.f32 %v167_v47, %v140_v17 }
 0x12c   :  { %v172_v50 = vrot.slane %v163_v48, %v166_v42 }
 0x12e   :  { %v173_v51 = vadd.f32 %v172_v50, %v168_v49 }
 0x130   :  { %v174_v52 = vpack.c.bf16 %v173_v51, %v173_v51 }
 0x132   :  { %356 = vmatmul.mubr.bf16.vlgmr.msra.gmra.mxu1 %v174_v52 }
 0x1f2   :  { %v277_v54 = vpop.f32.mrf.mxu1 }
 0x1f3   :  { %v278_v55 = vadd.f32 %v310_v53, %v277_v54 }
 0x1f4   :  { %v357_v56 = vpop.f32.mrf.mxu1 }
 0x1f5   :  { %v283_v57 = vsub.f32 0.0, %v278_v55 }
 0x1f6   :  { %v280_v58 = vpop.f32.mrf.mxu1 }
 0x1f7   :  { %v284_v59 = vmul.f32 1.442695, %v283_v57 }
 0x1f8   :  { %v358_v60 = vpop.f32.mrf.mxu1 }
 0x1f9   :  { %380 = vpow2.f32 %v284_v59 }
 0x206   :  { %v381_v61 = vpop.eup %380 }
 0x207   :  { %v286_v62 = vadd.f32 1.0, %v381_v61 }
 0x209   :  { %382 = vrcp.f32 %v286_v62 }
 0x216   :  { %v383_v63 = vpop.eup %382 }
 0x217   :  { %288 = vst [vmem:[#allocation10] sm:$0xff] %v383_v63 }
 0x218   :  { %475 = shalt.err (!%p472_p10)
}
 0x219   :  { %298 = dma.vmem_to_hbm [thread:$0]  %s296_s3, 128, %s545_s4, [#allocation4]  }
 0x21a   :  { %490 = dma.done.wait [#allocation4], 128  }
 0x21b   :  { %491 = vsyncadd [#allocation4], 4294967168 }
 0x21c   :  { %302 = vsyncpa [#allocation3], 1 }
 0x21d   :  { %303 = vsyncpa [#allocation6], 1 }
 0x21e   :  { %304 = vsyncpa [#allocation9], 1 }
 0x21f   :  { %305 = vsyncpa [#allocation4], 1 }

</bundles_post_ra>
